<compile_context>
chip_gen: v7x
topology: tpu7x:2x2x1
jax: 0.10.0
libtpu: 0.0.40
codegen_flags: <defaults>
</compile_context>

<pallas_src>
import functools

import numpy as np
import jax
import jax.numpy as jnp
from jax.experimental import pallas as pl
from jax.experimental.pallas import tpu as pltpu


def _round_up(x, m):
    return (x + m - 1) // m * m


def _tpu_vmem_capacity_bytes():
    try:
        return int(pltpu.get_tpu_info().vmem_capacity_bytes)
    except Exception:
        return 128 * 1024 * 1024  # v5e/v6e default; v7x has 64 MiB


# -----------------------------------------------------------------------------
# Pallas kernels: 3-tap conv-as-GEMM with fused bias / residual / ReLU epilogue
# -----------------------------------------------------------------------------

def _accumulate_taps(xw_ref, w_ref, *, w_cols, n_rows):
    """Sum of 3 H-offset matmuls.  xw_ref rows include a 1-row (= w_cols) halo
    above and below, so tap dh reads rows [dh*w_cols, dh*w_cols + n_rows)."""
    acc = jnp.dot(xw_ref[pl.ds(0, n_rows), :], w_ref[0],
                  preferred_element_type=jnp.float32)
    for dh in (1, 2):
        acc = acc + jnp.dot(xw_ref[pl.ds(dh * w_cols, n_rows), :], w_ref[dh],
                            preferred_element_type=jnp.float32)
    return acc


def conv3tap_bias_relu_kernel(xw_ref, w_ref, b_ref, o_ref, *, w_cols):
    """o = relu(conv3x3(x) + b)   (bf16 MXU inputs, f32 accumulate/epilogue)."""
    n_rows = o_ref.shape[0]
    acc = _accumulate_taps(xw_ref, w_ref, w_cols=w_cols, n_rows=n_rows)
    o_ref[...] = jnp.maximum(acc + b_ref[...], 0.0).astype(o_ref.dtype)


def conv3tap_bias_add_relu_kernel(xw_ref, w_ref, b_ref, r_ref, o_ref, *, w_cols):
    """o = relu(conv3x3(x) + b + residual)."""
    n_rows = o_ref.shape[0]
    acc = _accumulate_taps(xw_ref, w_ref, w_cols=w_cols, n_rows=n_rows)
    acc = acc + b_ref[...] + r_ref[...].astype(jnp.float32)
    o_ref[...] = jnp.maximum(acc, 0.0).astype(o_ref.dtype)


def _conv3x3_gemm(xw_blocks, w3, bias, residual=None, *, w_cols,
                  out_dtype=jnp.bfloat16, vmem_limit=48 * 1024 * 1024):
    """Tiled 3-tap conv GEMM + epilogue.

    xw_blocks: [B, (rh+2)*W, Kt] bf16   row-halo blocks (W-im2col'd channels)
    w3       : [3, Kt, Cop]      bf16   per-dh weight slabs (VMEM resident)
    bias     : [1, Cop]          f32    (resident)
    residual : [B, rh*W, Cop]    bf16 or None
    returns  : [B, rh*W, Cop]    out_dtype
    """
    B, rin, kt = xw_blocks.shape
    mv = rin - 2 * w_cols          # output rows per block
    cop = w3.shape[-1]

    in_specs = [
        pl.BlockSpec((None, rin, kt), lambda i: (i, 0, 0)),   # halo input tile
        pl.BlockSpec((3, kt, cop), lambda i: (0, 0, 0)),      # weights resident
        pl.BlockSpec((1, cop), lambda i: (0, 0)),             # bias resident
    ]
    args = [xw_blocks, w3, bias]
    kernel = functools.partial(conv3tap_bias_relu_kernel, w_cols=w_cols)
    bytes_accessed = (xw_blocks.size * 2 + w3.size * 2 + bias.size * 4
                      + B * mv * cop * 2)
    if residual is not None:
        in_specs.append(pl.BlockSpec((None, mv, cop), lambda i: (i, 0, 0)))
        args.append(residual)
        kernel = functools.partial(conv3tap_bias_add_relu_kernel, w_cols=w_cols)
        bytes_accessed += residual.size * 2

    cost = pl.CostEstimate(flops=2 * 3 * B * mv * kt * cop,
                           transcendentals=0,
                           bytes_accessed=int(bytes_accessed))

    return pl.pallas_call(
        kernel,
        out_shape=jax.ShapeDtypeStruct((B, mv, cop), out_dtype),
        grid=(B,),
        in_specs=in_specs,
        out_specs=pl.BlockSpec((None, mv, cop), lambda i: (i, 0, 0)),
        compiler_params=pltpu.CompilerParams(
            dimension_semantics=("parallel",),
            vmem_limit_bytes=int(vmem_limit),
        ),
        cost_estimate=cost,
    )(*args)


# -----------------------------------------------------------------------------
# Wrapper: W-only im2col + row-halo blocking + BN folding in XLA (under jit)
# -----------------------------------------------------------------------------

def fold_bn(gamma, beta, mean, var, eps=1e-5):
    scale = gamma / jnp.sqrt(var + eps)
    shift = beta - mean * scale
    return scale, shift


def _w_im2col(x):
    """[N,H,W,C] -> [N,H,W,3C]: columns (w-1, w, w+1), zero padded at W edges."""
    N, H, W, C = x.shape
    xp = jnp.pad(x, ((0, 0), (0, 0), (1, 1), (0, 0)))
    return jnp.concatenate([xp[:, :, dw:dw + W, :] for dw in range(3)], axis=-1)


def _row_blocks_with_halo(xw, rh, kt):
    """[N,H,W,K] -> [N*nblk, (rh+2)*W, kt] bf16: 1-row zero/neighbor halo above
    and below each rh-row block, channels zero-padded to kt."""
    N, H, W, K = xw.shape
    nblk = H // rh
    xp = jnp.pad(xw, ((0, 0), (1, 1), (0, 0), (0, kt - K)))
    blocks = jnp.stack([xp[:, b * rh:b * rh + rh + 2] for b in range(nblk)],
                       axis=1)                          # [N, nblk, rh+2, W, kt]
    return blocks.reshape(N * nblk, (rh + 2) * W, kt).astype(jnp.bfloat16)


def _row_blocks(x, rh, cop):
    """[N,H,W,C] -> [N*nblk, rh*W, cop] bf16 (no halo, channels zero-padded)."""
    N, H, W, C = x.shape
    nblk = H // rh
    xp = jnp.pad(x, ((0, 0), (0, 0), (0, 0), (0, cop - C)))
    return xp.reshape(N * nblk, rh * W, cop).astype(jnp.bfloat16)


def _step_vmem_bytes(rin, mv, kt, cop, with_res):
    b = 2 * rin * kt * 2            # double-buffered bf16 halo input tile
    b += 2 * 3 * kt * cop * 2       # weights (conservatively x2)
    b += 2 * cop * 4                # bias
    b += 2 * mv * cop * 2           # double-buffered bf16 output tile
    if with_res:
        b += 2 * mv * cop * 2       # bf16 residual tile
    b += mv * cop * 4               # f32 accumulator
    return b


def _choose_rows_per_block(N, H, W, kt_max, cop, vmem_budget):
    """Pick rows-per-block: ~512 output rows per tile, fits VMEM budget, and
    gives the pipeline / v7x megacore at least ~8 grid steps."""
    divs = sorted([d for d in range(1, H + 1) if H % d == 0], reverse=True)
    target = max(1, 512 // max(W, 1))
    rh = next((d for d in divs if d <= target), 1)
    while rh > 1 and _step_vmem_bytes((rh + 2) * W, rh * W, kt_max, cop,
                                      True) > vmem_budget:
        rh = max(d for d in divs if d < rh)
    while N * (H // rh) < 8 and rh > 1:
        rh = max(d for d in divs if d < rh)
    return rh


def _basic_block_impl(x_nchw, params):
    w1, w2 = params["w1"], params["w2"]          # HWIO [3,3,Cin,Co], [3,3,Co,Co]
    s1, b1 = fold_bn(*params["bn1"])
    s2, b2 = fold_bn(*params["bn2"])

    x = jnp.transpose(x_nchw, (0, 2, 3, 1)).astype(jnp.float32)   # NHWC
    N, H, W, Cin = x.shape
    Co = w1.shape[-1]
    assert Cin == Co, "BasicBlock with downsample=None requires inplanes == planes"

    cop = _round_up(Co, 128)
    k1t = _round_up(3 * Cin, 128)
    k2t = _round_up(3 * Co, 128)

    cap = _tpu_vmem_capacity_bytes()
    rh = _choose_rows_per_block(N, H, W, max(k1t, k2t), cop, int(0.5 * cap))
    mv = rh * W
    step_bytes = _step_vmem_bytes((rh + 2) * W, mv, max(k1t, k2t), cop, True)
    vmem_limit = int(min(max(2 * step_bytes, 32 * 1024 * 1024), 0.85 * cap))

    # Fold BN scales into conv weights; per-dh slabs [3, 3*C, Co] (rows = dw*C+c).
    w1p = jnp.pad((w1 * s1).reshape(3, 3 * Cin, Co),
                  ((0, 0), (0, k1t - 3 * Cin), (0, cop - Co))).astype(jnp.bfloat16)
    w2p = jnp.pad((w2 * s2).reshape(3, 3 * Co, Co),
                  ((0, 0), (0, k2t - 3 * Co), (0, cop - Co))).astype(jnp.bfloat16)
    b1p = jnp.pad(b1.reshape(1, Co), ((0, 0), (0, cop - Co))).astype(jnp.float32)
    b2p = jnp.pad(b2.reshape(1, Co), ((0, 0), (0, cop - Co))).astype(jnp.float32)

    # ---- stage 1: t = relu(bn1(conv1(x))) ----
    xw1 = _row_blocks_with_halo(_w_im2col(x), rh, k1t)
    t_blocks = _conv3x3_gemm(xw1, w1p, b1p, w_cols=W,
                             out_dtype=jnp.bfloat16, vmem_limit=vmem_limit)
    t = t_blocks.reshape(N, H, W, cop)[..., :Co]        # bf16, pad cols dropped

    # ---- stage 2: out = relu(bn2(conv2(t)) + x) ----
    xw2 = _row_blocks_with_halo(_w_im2col(t), rh, k2t)
    res = _row_blocks(x, rh, cop)                       # bf16 residual stream
    out_blocks = _conv3x3_gemm(xw2, w2p, b2p, residual=res, w_cols=W,
                               out_dtype=jnp.bfloat16, vmem_limit=vmem_limit)
    out = out_blocks.reshape(N, H, W, cop)[..., :Co].astype(jnp.float32)
    return jnp.transpose(out, (0, 3, 1, 2))             # back to NCHW


basic_block_forward = jax.jit(_basic_block_impl)


def reference_forward(x_nchw, params):
    """Pure-JAX high-precision reference for verification."""
    w1, w2 = params["w1"], params["w2"]
    s1, b1 = fold_bn(*params["bn1"])
    s2, b2 = fold_bn(*params["bn2"])
    x = jnp.transpose(x_nchw, (0, 2, 3, 1)).astype(jnp.float32)
    dn = ("NHWC", "HWIO", "NHWC")
    y = jax.lax.conv_general_dilated(x, w1, (1, 1), "SAME", dimension_numbers=dn,
                                     precision=jax.lax.Precision.HIGHEST)
    y = jnp.maximum(y * s1 + b1, 0.0)
    y = jax.lax.conv_general_dilated(y, w2, (1, 1), "SAME", dimension_numbers=dn,
                                     precision=jax.lax.Precision.HIGHEST)
    y = y * s2 + b2
    y = jnp.maximum(y + x, 0.0)
    return jnp.transpose(y, (0, 3, 1, 2))


if __name__ == "__main__":
    # Small shapes consistent with the module: inplanes == planes (downsample=None)
    N, C, H, W = 2, 8, 16, 16      # x: NCHW
    inplanes = planes = C

    key = jax.random.PRNGKey(0)
    kx, kw1, kw2, kg1, kb1, kg2, kb2, km1, km2 = jax.random.split(key, 9)

    x = jax.random.normal(kx, (N, C, H, W), jnp.float32)

    params = {
        # HWIO conv weights (torch conv3x3: kernel 3x3, no bias)
        "w1": 0.1 * jax.random.normal(kw1, (3, 3, inplanes, planes), jnp.float32),
        "w2": 0.1 * jax.random.normal(kw2, (3, 3, planes, planes), jnp.float32),
        # BatchNorm2d(planes) in inference mode: (gamma, beta, mean, var)
        "bn1": (1.0 + 0.1 * jax.random.normal(kg1, (planes,), jnp.float32),
                0.1 * jax.random.normal(kb1, (planes,), jnp.float32),
                0.1 * jax.random.normal(km1, (planes,), jnp.float32),
                jnp.abs(1.0 + 0.1 * jax.random.normal(km2, (planes,), jnp.float32))),
        "bn2": (1.0 + 0.1 * jax.random.normal(kg2, (planes,), jnp.float32),
                0.1 * jax.random.normal(kb2, (planes,), jnp.float32),
                jnp.zeros((planes,), jnp.float32),
                jnp.ones((planes,), jnp.float32)),
    }

    out = jax.block_until_ready(basic_block_forward(x, params))
    ref = jax.block_until_ready(reference_forward(x, params))

    assert out.shape == (N, planes, H, W), out.shape
    assert np.allclose(np.asarray(out), np.asarray(ref), rtol=2e-2, atol=2e-2), (
        "mismatch vs reference: max abs err = "
        f"{np.max(np.abs(np.asarray(out) - np.asarray(ref)))}")

    print("KERNEL_OK")
</pallas_src>

<mosaic_0001>
module attributes {stable_mosaic.version = 11 : i64} {
  func.func @conv3tap_bias_relu_kernel(%arg0: i32, %arg1: memref<1x96x128xbf16, #tpu.memory_space<vmem>>, %arg2: memref<3x128x128xbf16, #tpu.memory_space<vmem>>, %arg3: memref<1x128xf32, #tpu.memory_space<vmem>>, %arg4: memref<1x64x128xbf16, #tpu.memory_space<vmem>>) attributes {dimension_semantics = [#tpu.dimension_semantics<parallel>], iteration_bounds = array<i64: 8>, scalar_prefetch = 0 : i64, scratch_operands = 0 : i64, tpu.core_type = #tpu.core_type<tc>, window_params = [{transform_indices = @transform_0, window_bounds = array<i64: 1, 96, 128>}, {pipeline_mode = #tpu.pipeline_mode<synchronous>, transform_indices = @transform_1, window_bounds = array<i64: 3, 128, 128>}, {pipeline_mode = #tpu.pipeline_mode<synchronous>, transform_indices = @transform_2, window_bounds = array<i64: 1, 128>}, {transform_indices = @transform_3, window_bounds = array<i64: 1, 64, 128>}]} {
    %c0 = arith.constant 0 : index
    %c0_0 = arith.constant 0 : index
    %c0_1 = arith.constant 0 : index
    %0 = vector.load %arg1[%c0, %c0_0, %c0_1] : memref<1x96x128xbf16, #tpu.memory_space<vmem>>, vector<1x64x128xbf16>
    %1 = vector.shape_cast %0 : vector<1x64x128xbf16> to vector<64x128xbf16>
    %c0_2 = arith.constant 0 : index
    %c0_3 = arith.constant 0 : index
    %c0_4 = arith.constant 0 : index
    %2 = vector.load %arg2[%c0_2, %c0_3, %c0_4] : memref<3x128x128xbf16, #tpu.memory_space<vmem>>, vector<1x128x128xbf16>
    %3 = vector.shape_cast %2 : vector<1x128x128xbf16> to vector<128x128xbf16>
    %cst = arith.constant dense<0.000000e+00> : vector<64x128xf32>
    %4 = tpu.matmul %1, %3, %cst {dimension_numbers = #tpu.dot_dimension_numbers<[1], [0], [0], [1], [0, 0, 1, 1], [], []>} : vector<64x128xbf16>, vector<128x128xbf16>, vector<64x128xf32> -> vector<64x128xf32>
    %c0_5 = arith.constant 0 : index
    %c16 = arith.constant 16 : index
    %c0_6 = arith.constant 0 : index
    %5 = vector.load %arg1[%c0_5, %c16, %c0_6] : memref<1x96x128xbf16, #tpu.memory_space<vmem>>, vector<1x64x128xbf16>
    %6 = vector.shape_cast %5 : vector<1x64x128xbf16> to vector<64x128xbf16>
    %c1 = arith.constant 1 : index
    %c0_7 = arith.constant 0 : index
    %c0_8 = arith.constant 0 : index
    %7 = vector.load %arg2[%c1, %c0_7, %c0_8] : memref<3x128x128xbf16, #tpu.memory_space<vmem>>, vector<1x128x128xbf16>
    %8 = vector.shape_cast %7 : vector<1x128x128xbf16> to vector<128x128xbf16>
    %cst_9 = arith.constant dense<0.000000e+00> : vector<64x128xf32>
    %9 = tpu.matmul %6, %8, %cst_9 {dimension_numbers = #tpu.dot_dimension_numbers<[1], [0], [0], [1], [0, 0, 1, 1], [], []>} : vector<64x128xbf16>, vector<128x128xbf16>, vector<64x128xf32> -> vector<64x128xf32>
    %10 = arith.addf %4, %9 : vector<64x128xf32>
    %c0_10 = arith.constant 0 : index
    %c32 = arith.constant 32 : index
    %c0_11 = arith.constant 0 : index
    %11 = vector.load %arg1[%c0_10, %c32, %c0_11] : memref<1x96x128xbf16, #tpu.memory_space<vmem>>, vector<1x64x128xbf16>
    %12 = vector.shape_cast %11 : vector<1x64x128xbf16> to vector<64x128xbf16>
    %c2 = arith.constant 2 : index
    %c0_12 = arith.constant 0 : index
    %c0_13 = arith.constant 0 : index
    %13 = vector.load %arg2[%c2, %c0_12, %c0_13] : memref<3x128x128xbf16, #tpu.memory_space<vmem>>, vector<1x128x128xbf16>
    %14 = vector.shape_cast %13 : vector<1x128x128xbf16> to vector<128x128xbf16>
    %cst_14 = arith.constant dense<0.000000e+00> : vector<64x128xf32>
    %15 = tpu.matmul %12, %14, %cst_14 {dimension_numbers = #tpu.dot_dimension_numbers<[1], [0], [0], [1], [0, 0, 1, 1], [], []>} : vector<64x128xbf16>, vector<128x128xbf16>, vector<64x128xf32> -> vector<64x128xf32>
    %16 = arith.addf %10, %15 : vector<64x128xf32>
    %c0_15 = arith.constant 0 : index
    %c0_16 = arith.constant 0 : index
    %17 = vector.load %arg3[%c0_15, %c0_16] : memref<1x128xf32, #tpu.memory_space<vmem>>, vector<1x128xf32>
    %18 = vector.broadcast %17 : vector<1x128xf32> to vector<64x128xf32>
    %19 = arith.addf %16, %18 : vector<64x128xf32>
    %cst_17 = arith.constant 0.000000e+00 : f32
    %20 = vector.broadcast %cst_17 : f32 to vector<64x128xf32>
    %21 = arith.maximumf %19, %20 : vector<64x128xf32>
    %22 = arith.truncf %21 : vector<64x128xf32> to vector<64x128xbf16>
    %c0_18 = arith.constant 0 : index
    %c0_19 = arith.constant 0 : index
    %c0_20 = arith.constant 0 : index
    %23 = vector.load %arg4[%c0_18, %c0_19, %c0_20] : memref<1x64x128xbf16, #tpu.memory_space<vmem>>, vector<1x64x128xbf16>
    %24 = vector.shape_cast %23 : vector<1x64x128xbf16> to vector<64x128xbf16>
    %25 = vector.shape_cast %22 : vector<64x128xbf16> to vector<1x64x128xbf16>
    tpu.vector_store %arg4[%c0_18, %c0_19, %c0_20], %25 {strides = array<i32>} : memref<1x64x128xbf16, #tpu.memory_space<vmem>>, vector<1x64x128xbf16>,
    return
  }
  func.func @transform_0(%arg0: i32) -> (i32, i32, i32) {
    %c0_i32 = arith.constant 0 : i32
    %c0_i32_0 = arith.constant 0 : i32
    %c0_i32_1 = arith.constant 0 : i32
    return %arg0, %c0_i32, %c0_i32_0 : i32, i32, i32
  }
  func.func @transform_1(%arg0: i32) -> (i32, i32, i32) {
    %c0_i32 = arith.constant 0 : i32
    %c0_i32_0 = arith.constant 0 : i32
    %c0_i32_1 = arith.constant 0 : i32
    %c0_i32_2 = arith.constant 0 : i32
    return %c0_i32, %c0_i32_0, %c0_i32_1 : i32, i32, i32
  }
  func.func @transform_2(%arg0: i32) -> (i32, i32) {
    %c0_i32 = arith.constant 0 : i32
    %c0_i32_0 = arith.constant 0 : i32
    %c0_i32_1 = arith.constant 0 : i32
    return %c0_i32, %c0_i32_0 : i32, i32
  }
  func.func @transform_3(%arg0: i32) -> (i32, i32, i32) {
    %c0_i32 = arith.constant 0 : i32
    %c0_i32_0 = arith.constant 0 : i32
    %c0_i32_1 = arith.constant 0 : i32
    return %arg0, %c0_i32, %c0_i32_0 : i32, i32, i32
  }
}

module attributes {stable_mosaic.version = 11 : i64} {
  func.func @conv3tap_bias_add_relu_kernel(%arg0: i32, %arg1: memref<1x96x128xbf16, #tpu.memory_space<vmem>>, %arg2: memref<3x128x128xbf16, #tpu.memory_space<vmem>>, %arg3: memref<1x128xf32, #tpu.memory_space<vmem>>, %arg4: memref<1x64x128xbf16, #tpu.memory_space<vmem>>, %arg5: memref<1x64x128xbf16, #tpu.memory_space<vmem>>) attributes {dimension_semantics = [#tpu.dimension_semantics<parallel>], iteration_bounds = array<i64: 8>, scalar_prefetch = 0 : i64, scratch_operands = 0 : i64, tpu.core_type = #tpu.core_type<tc>, window_params = [{transform_indices = @transform_0, window_bounds = array<i64: 1, 96, 128>}, {pipeline_mode = #tpu.pipeline_mode<synchronous>, transform_indices = @transform_1, window_bounds = array<i64: 3, 128, 128>}, {pipeline_mode = #tpu.pipeline_mode<synchronous>, transform_indices = @transform_2, window_bounds = array<i64: 1, 128>}, {transform_indices = @transform_3, window_bounds = array<i64: 1, 64, 128>}, {transform_indices = @transform_4, window_bounds = array<i64: 1, 64, 128>}]} {
    %c0 = arith.constant 0 : index
    %c0_0 = arith.constant 0 : index
    %c0_1 = arith.constant 0 : index
    %0 = vector.load %arg1[%c0, %c0_0, %c0_1] : memref<1x96x128xbf16, #tpu.memory_space<vmem>>, vector<1x64x128xbf16>
    %1 = vector.shape_cast %0 : vector<1x64x128xbf16> to vector<64x128xbf16>
    %c0_2 = arith.constant 0 : index
    %c0_3 = arith.constant 0 : index
    %c0_4 = arith.constant 0 : index
    %2 = vector.load %arg2[%c0_2, %c0_3, %c0_4] : memref<3x128x128xbf16, #tpu.memory_space<vmem>>, vector<1x128x128xbf16>
    %3 = vector.shape_cast %2 : vector<1x128x128xbf16> to vector<128x128xbf16>
    %cst = arith.constant dense<0.000000e+00> : vector<64x128xf32>
    %4 = tpu.matmul %1, %3, %cst {dimension_numbers = #tpu.dot_dimension_numbers<[1], [0], [0], [1], [0, 0, 1, 1], [], []>} : vector<64x128xbf16>, vector<128x128xbf16>, vector<64x128xf32> -> vector<64x128xf32>
    %c0_5 = arith.constant 0 : index
    %c16 = arith.constant 16 : index
    %c0_6 = arith.constant 0 : index
    %5 = vector.load %arg1[%c0_5, %c16, %c0_6] : memref<1x96x128xbf16, #tpu.memory_space<vmem>>, vector<1x64x128xbf16>
    %6 = vector.shape_cast %5 : vector<1x64x128xbf16> to vector<64x128xbf16>
    %c1 = arith.constant 1 : index
    %c0_7 = arith.constant 0 : index
    %c0_8 = arith.constant 0 : index
    %7 = vector.load %arg2[%c1, %c0_7, %c0_8] : memref<3x128x128xbf16, #tpu.memory_space<vmem>>, vector<1x128x128xbf16>
    %8 = vector.shape_cast %7 : vector<1x128x128xbf16> to vector<128x128xbf16>
    %cst_9 = arith.constant dense<0.000000e+00> : vector<64x128xf32>
    %9 = tpu.matmul %6, %8, %cst_9 {dimension_numbers = #tpu.dot_dimension_numbers<[1], [0], [0], [1], [0, 0, 1, 1], [], []>} : vector<64x128xbf16>, vector<128x128xbf16>, vector<64x128xf32> -> vector<64x128xf32>
    %10 = arith.addf %4, %9 : vector<64x128xf32>
    %c0_10 = arith.constant 0 : index
    %c32 = arith.constant 32 : index
    %c0_11 = arith.constant 0 : index
    %11 = vector.load %arg1[%c0_10, %c32, %c0_11] : memref<1x96x128xbf16, #tpu.memory_space<vmem>>, vector<1x64x128xbf16>
    %12 = vector.shape_cast %11 : vector<1x64x128xbf16> to vector<64x128xbf16>
    %c2 = arith.constant 2 : index
    %c0_12 = arith.constant 0 : index
    %c0_13 = arith.constant 0 : index
    %13 = vector.load %arg2[%c2, %c0_12, %c0_13] : memref<3x128x128xbf16, #tpu.memory_space<vmem>>, vector<1x128x128xbf16>
    %14 = vector.shape_cast %13 : vector<1x128x128xbf16> to vector<128x128xbf16>
    %cst_14 = arith.constant dense<0.000000e+00> : vector<64x128xf32>
    %15 = tpu.matmul %12, %14, %cst_14 {dimension_numbers = #tpu.dot_dimension_numbers<[1], [0], [0], [1], [0, 0, 1, 1], [], []>} : vector<64x128xbf16>, vector<128x128xbf16>, vector<64x128xf32> -> vector<64x128xf32>
    %16 = arith.addf %10, %15 : vector<64x128xf32>
    %c0_15 = arith.constant 0 : index
    %c0_16 = arith.constant 0 : index
    %17 = vector.load %arg3[%c0_15, %c0_16] : memref<1x128xf32, #tpu.memory_space<vmem>>, vector<1x128xf32>
    %18 = vector.broadcast %17 : vector<1x128xf32> to vector<64x128xf32>
    %19 = arith.addf %16, %18 : vector<64x128xf32>
    %c0_17 = arith.constant 0 : index
    %c0_18 = arith.constant 0 : index
    %c0_19 = arith.constant 0 : index
    %20 = vector.load %arg4[%c0_17, %c0_18, %c0_19] : memref<1x64x128xbf16, #tpu.memory_space<vmem>>, vector<1x64x128xbf16>
    %21 = vector.shape_cast %20 : vector<1x64x128xbf16> to vector<64x128xbf16>
    %22 = arith.extf %21 : vector<64x128xbf16> to vector<64x128xf32>
    %23 = arith.addf %19, %22 : vector<64x128xf32>
    %cst_20 = arith.constant 0.000000e+00 : f32
    %24 = vector.broadcast %cst_20 : f32 to vector<64x128xf32>
    %25 = arith.maximumf %23, %24 : vector<64x128xf32>
    %26 = arith.truncf %25 : vector<64x128xf32> to vector<64x128xbf16>
    %c0_21 = arith.constant 0 : index
    %c0_22 = arith.constant 0 : index
    %c0_23 = arith.constant 0 : index
    %27 = vector.load %arg5[%c0_21, %c0_22, %c0_23] : memref<1x64x128xbf16, #tpu.memory_space<vmem>>, vector<1x64x128xbf16>
    %28 = vector.shape_cast %27 : vector<1x64x128xbf16> to vector<64x128xbf16>
    %29 = vector.shape_cast %26 : vector<64x128xbf16> to vector<1x64x128xbf16>
    tpu.vector_store %arg5[%c0_21, %c0_22, %c0_23], %29 {strides = array<i32>} : memref<1x64x128xbf16, #tpu.memory_space<vmem>>, vector<1x64x128xbf16>,
    return
  }
  func.func @transform_0(%arg0: i32) -> (i32, i32, i32) {
    %c0_i32 = arith.constant 0 : i32
    %c0_i32_0 = arith.constant 0 : i32
    %c0_i32_1 = arith.constant 0 : i32
    return %arg0, %c0_i32, %c0_i32_0 : i32, i32, i32
  }
  func.func @transform_1(%arg0: i32) -> (i32, i32, i32) {
    %c0_i32 = arith.constant 0 : i32
    %c0_i32_0 = arith.constant 0 : i32
    %c0_i32_1 = arith.constant 0 : i32
    %c0_i32_2 = arith.constant 0 : i32
    return %c0_i32, %c0_i32_0, %c0_i32_1 : i32, i32, i32
  }
  func.func @transform_2(%arg0: i32) -> (i32, i32) {
    %c0_i32 = arith.constant 0 : i32
    %c0_i32_0 = arith.constant 0 : i32
    %c0_i32_1 = arith.constant 0 : i32
    return %c0_i32, %c0_i32_0 : i32, i32
  }
  func.func @transform_3(%arg0: i32) -> (i32, i32, i32) {
    %c0_i32 = arith.constant 0 : i32
    %c0_i32_0 = arith.constant 0 : i32
    %c0_i32_1 = arith.constant 0 : i32
    return %arg0, %c0_i32, %c0_i32_0 : i32, i32, i32
  }
  func.func @transform_4(%arg0: i32) -> (i32, i32, i32) {
    %c0_i32 = arith.constant 0 : i32
    %c0_i32_0 = arith.constant 0 : i32
    %c0_i32_1 = arith.constant 0 : i32
    return %arg0, %c0_i32, %c0_i32_0 : i32, i32, i32
  }
}

</mosaic_0001>

<bundles_post_ra>
// kernel: _basic_block_impl.2
= control target key start
LH: loop header
LB: loop body
LE: loop exit
PB: predicated region body
PF: predicated region fallthrough
CT: control target
= control target key end

     0   :  { %s1085_s12 = smov 0   ;;  %s1192_s0 = inlined_call_operand.vmem [shape: bf16[8,96,128], index: 0, kind: input, shape index: {}]   ;;  %s1193_s1 = inlined_call_operand.vmem [shape: bf16[3,128,128], index: 1, kind: input, shape index: {}]   ;;  %s1194_s2 = inlined_call_operand.vmem [shape: f32[1,128], index: 2, kind: input, shape index: {}]   ;;  %s1195_s3 = inlined_call_operand.vmem [shape: bf16[8,64,128], index: 3, kind: output, shape index: {}]  }
   0x1 LB: > { %s759_s13 = sadd.s32 4294967295, %s1063_s12   ;;  %p763_p0 = scmp.ge.s32.totalorder %s1063_s12, 1  ;;  %s1063_s12 = sphi %s1085_s12, %s13_s12  }
   0x2   : > { %p137_p1 = scmp.lt.s32.totalorder %s1063_s12, 9 }
   0x4   : > { %p138_p2 = pnand %p763_p0, %p137_p1 }
   0x5   : > { %v1024_v0 = vld [vmem:[%s1193_s1 + $0x40] sm:$0xff] (!%p138_p2)   ;;  %p161_p3 = scmp.lt.s32.totalorder (!%p138_p2), %s759_s13, 7  ;;  %v1026_v2 = vld [vmem:[%s1193_s1 + $0x48] sm:$0xff] (!%p138_p2)   ;;  %v1028_v4 = vld [vmem:[%s1193_s1 + $0x50] sm:$0xff] (!%p138_p2)  }
   0x6   : > { %141 = sbr.rel (%p138_p2) target bundleno = 295 (0x127), region = 32  ;;  %v1025_v1 = vld [vmem:[%s1193_s1] sm:$0xff] (!%p138_p2)   ;;  %911 = vmatprep.subr.bf16.mxu1 (!%p138_p2), %v1024_v0  ;;  %v1027_v3 = vld [vmem:[%s1193_s1 + $0x8] sm:$0xff] (!%p138_p2)   ;;  %v1029_v5 = vld [vmem:[%s1193_s1 + $0x10] sm:$0xff] (!%p138_p2)  }
   0x7   : > { %935 = vmatprep.subr.bf16.mxu0 (!%p138_p2), %v1025_v1  ;;  %912 = vmatpush3.bf16.msra.mxu1 (!%p138_p2), %v1024_v0  ;;  %v1030_v6 = vld [vmem:[%s1193_s1 + $0x58] sm:$0xff] (!%p138_p2)   ;;  %v1032_v8 = vld [vmem:[%s1193_s1 + $0x60] sm:$0xff] (!%p138_p2)   ;;  %v1034_v10 = vld [vmem:[%s1193_s1 + $0x68] sm:$0xff] (!%p138_p2)  }
   0x8   : > { %936 = vmatpush3.bf16.msra.mxu0 (!%p138_p2), %v1025_v1  ;;  %913 = vmatprep.subr.bf16.mxu1 (!%p138_p2), %v1026_v2  ;;  %v1031_v7 = vld [vmem:[%s1193_s1 + $0x18] sm:$0xff] (!%p138_p2)   ;;  %v1033_v9 = vld [vmem:[%s1193_s1 + $0x20] sm:$0xff] (!%p138_p2)   ;;  %v1035_v12 = vld [vmem:[%s1193_s1 + $0x28] sm:$0xff] (!%p138_p2)  }
   0x9   : > { %937 = vmatprep.subr.bf16.mxu0 (!%p138_p2), %v1027_v3  ;;  %v1036_v14 = vld [vmem:[%s1193_s1 + $0x70] sm:$0xff] (!%p138_p2)   ;;  %v1038_v16 = vld [vmem:[%s1193_s1 + $0x78] sm:$0xff] (!%p138_p2)   ;;  %v1043_v18 = vld [vmem:[%s1193_s1 + $0x80] sm:$0xff] (!%p138_p2)  }
   0xa   : > { %v1037_v15 = vld [vmem:[%s1193_s1 + $0x30] sm:$0xff] (!%p138_p2)   ;;  %v1039_v17 = vld [vmem:[%s1193_s1 + $0x38] sm:$0xff] (!%p138_p2)   ;;  %v1044_v20 = vld [vmem:[%s1193_s1 + $0x88] sm:$0xff] (!%p138_p2)  }
   0xb   : > { %914 = vmatpush3.bf16.msra.mxu1 (!%p138_p2), %v1026_v2  ;;  %v1045_v22 = vld [vmem:[%s1193_s1 + $0x90] sm:$0xff] (!%p138_p2)   ;;  %v1046_v24 = vld [vmem:[%s1193_s1 + $0x98] sm:$0xff] (!%p138_p2)   ;;  %v1047_v27 = vld [vmem:[%s1193_s1 + $0xa0] sm:$0xff] (!%p138_p2)  }
   0xc   : > { %938 = vmatpush3.bf16.msra.mxu0 (!%p138_p2), %v1027_v3  ;;  %915 = vmatprep.subr.bf16.mxu1 (!%p138_p2), %v1028_v4  ;;  %v1049_v28 = vld [vmem:[%s1193_s1 + $0xa8] sm:$0xff] (!%p138_p2)   ;;  %v1051_v29 = vld [vmem:[%s1193_s1 + $0xb0] sm:$0xff] (!%p138_p2)   ;;  %v1052_v30 = vld [vmem:[%s1193_s1 + $0xb8] sm:$0xff] (!%p138_p2)  }
   0xd   : > { %s1197_s13 = smov (!%p161_p3, %s759_s13), 7  ;;  %939 = vmatprep.subr.bf16.mxu0 %v1029_v5  ;;  %v832_v49 = vld [vmem:[%s1194_s2] ss:$0 sm:$0xff] }
   0xe   : > { %s1015_s30 = smul.u32 48, %s1197_s13  ;;  %s843_s18 = sshll.u32 %s1197_s13, 5 }
   0xf   : > { %916 = vmatpush3.bf16.msra.mxu1 %v1028_v4  ;;  %s170_s21 = scalar_lea.vmem %s1195_s3, %s843_s18 }
  0x10   : > { %940 = vmatpush3.bf16.msra.mxu0 %v1029_v5  ;;  %917 = vmatprep.subr.bf16.mxu1 %v1030_v6  ;;  %s1129_s10 = scalar_lea.vmem %s1192_s0, %s1015_s30 }
  0x11   : > { %941 = vmatprep.subr.bf16.mxu0 %v1031_v7  ;;  %v1040_v11 = vld [vmem:[%s1129_s10 + $0x8] sm:$0xff]   ;;  %v1042_v13 = vld [vmem:[%s1129_s10] sm:$0xff]   ;;  %v1041_v19 = vld [vmem:[%s1129_s10 + $0x10] sm:$0xff]  }
  0x12   : > { %927 = vmatprep.mubr.bf16.mxu1 %v1040_v11  ;;  %951 = vmatprep.mubr.bf16.mxu0 %v1042_v13  ;;  %v1048_v21 = vld [vmem:[%s1129_s10 + $0x18] sm:$0xff]   ;;  %v1050_v23 = vld [vmem:[%s1129_s10 + $0x20] sm:$0xff]   ;;  %v1053_v25 = vld [vmem:[%s1129_s10 + $0x10] sm:$0xff]  }
  0x13   : > { %918 = vmatpush3.bf16.msra.mxu1 %v1030_v6  ;;  %v1054_v26 = vld [vmem:[%s1129_s10 + $0x20] sm:$0xff]   ;;  %v1056_v31 = vld [vmem:[%s1129_s10 + $0x28] sm:$0xff]   ;;  %v1055_v32 = vld [vmem:[%s1129_s10 + $0x18] sm:$0xff]  }
  0x14   : > { %942 = vmatpush3.bf16.msra.mxu0 %v1031_v7  ;;  %919 = vmatprep.subr.bf16.mxu1 %v1032_v8 }
  0x15   : > { %943 = vmatprep.subr.bf16.mxu0 %v1033_v9 }
  0x17   : > { %920 = vmatpush3.bf16.msra.mxu1 %v1032_v8 }
  0x18   : > { %944 = vmatpush3.bf16.msra.mxu0 %v1033_v9  ;;  %921 = vmatprep.subr.bf16.mxu1 %v1034_v10 }
  0x19   : > { %945 = vmatprep.subr.bf16.mxu0 %v1035_v12 }
  0x1b   : > { %922 = vmatpush3.bf16.msra.mxu1 %v1034_v10 }
  0x1c   : > { %946 = vmatpush3.bf16.msra.mxu0 %v1035_v12  ;;  %923 = vmatprep.subr.bf16.mxu1 %v1036_v14 }
  0x1d   : > { %947 = vmatprep.subr.bf16.mxu0 %v1037_v15 }
  0x1f   : > { %924 = vmatpush3.bf16.msra.mxu1 %v1036_v14 }
  0x20   : > { %948 = vmatpush3.bf16.msra.mxu0 %v1037_v15  ;;  %925 = vmatprep.subr.bf16.mxu1 %v1038_v16 }
  0x21   : > { %949 = vmatprep.subr.bf16.mxu0 %v1039_v17 }
  0x23   : > { %926 = vmatpush3.bf16.msra.mxu1 %v1038_v16 }
  0x24   : > { %950 = vmatpush3.bf16.msra.mxu0 %v1039_v17  ;;  %983 = vmatprep.subr.bf16.mxu1 %v1043_v18 }
  0x25   : > { %959 = vmatprep.subr.bf16.mxu0 %v1043_v18 }
  0x26   : > { %928 = vmatmul.mubr.bf16.vlgmr.msra.gmra.mrb[0].mxu1 %v1041_v19 }
  0x27   : > { %952 = vmatmul.mubr.bf16.vlgmr.msra.gmra.mrb[0].mxu0 %v1040_v11  ;;  %991 = vmatpush3.bf16.msra.mxu1 %v1043_v18 }
  0x28   : > { %960 = vmatpush3.bf16.msra.mxu0 %v1043_v18  ;;  %984 = vmatprep.subr.bf16.mxu1 %v1044_v20 }
  0x29   : > { %961 = vmatprep.subr.bf16.mxu0 %v1044_v20  ;;  %931 = vmatprep.mubr.bf16.mxu1 %v1048_v21 }
  0x2a   : > { %955 = vmatprep.mubr.bf16.mxu0 %v1041_v19 }
  0x2b   : > { %992 = vmatpush3.bf16.msra.mxu1 %v1044_v20 }
  0x2c   : > { %962 = vmatpush3.bf16.msra.mxu0 %v1044_v20  ;;  %985 = vmatprep.subr.bf16.mxu1 %v1045_v22 }
  0x2d   : > { %963 = vmatprep.subr.bf16.mxu0 %v1045_v22 }
  0x2e   : > { %932 = vmatmul.mubr.bf16.gmra.mrb[4].mxu1 %v1050_v23 }
  0x2f   : > { %993 = vmatpush3.bf16.msra.mxu1 %v1045_v22  ;;  %956 = vmatmul.mubr.bf16.gmra.mrb[4].mxu0 %v1048_v21 }
  0x30   : > { %964 = vmatpush3.bf16.msra.mxu0 %v1045_v22  ;;  %986 = vmatprep.subr.bf16.mxu1 %v1046_v24 }
  0x31   : > { %965 = vmatprep.subr.bf16.mxu0 %v1046_v24  ;;  %975 = vmatprep.mubr.bf16.mxu0 %v1053_v25 }
  0x32   : > { %979 = vmatprep.mubr.bf16.mxu1 %v1054_v26 }
  0x33   : > { %994 = vmatpush3.bf16.msra.mxu1 %v1046_v24 }
  0x34   : > { %966 = vmatpush3.bf16.msra.mxu0 %v1046_v24  ;;  %987 = vmatprep.subr.bf16.mxu1 %v1047_v27 }
  0x35   : > { %967 = vmatprep.subr.bf16.mxu0 %v1047_v27 }
  0x37   : > { %995 = vmatpush3.bf16.msra.mxu1 %v1047_v27 }
  0x38   : > { %968 = vmatpush3.bf16.msra.mxu0 %v1047_v27  ;;  %988 = vmatprep.subr.bf16.mxu1 %v1049_v28 }
  0x39   : > { %969 = vmatprep.subr.bf16.mxu0 %v1049_v28 }
  0x3b   : > { %996 = vmatpush3.bf16.msra.mxu1 %v1049_v28 }
  0x3c   : > { %970 = vmatpush3.bf16.msra.mxu0 %v1049_v28  ;;  %989 = vmatprep.subr.bf16.mxu1 %v1051_v29 }
  0x3d   : > { %971 = vmatprep.subr.bf16.mxu0 %v1051_v29 }
  0x3f   : > { %997 = vmatpush3.bf16.msra.mxu1 %v1051_v29 }
  0x40   : > { %972 = vmatpush3.bf16.msra.mxu0 %v1051_v29  ;;  %990 = vmatprep.subr.bf16.mxu1 %v1052_v30 }
  0x41   : > { %973 = vmatprep.subr.bf16.mxu0 %v1052_v30 }
  0x43   : > { %998 = vmatpush3.bf16.msra.mxu1 %v1052_v30 }
  0x44   : > { %974 = vmatpush3.bf16.msra.mxu0 %v1052_v30 }
  0x46   : > { %980 = vmatmul.mubr.bf16.vlgmr.msra.gmra.mrb[8].mxu1 %v1056_v31 }
  0x47   : > { %976 = vmatmul.mubr.bf16.vlgmr.msra.gmra.mrb[0].mxu0 %v1055_v32 }
  0xf9   : > { %v929_v33 = vpop.f32.mrb[0].mxu1 }
  0xfa   : > { %v321_v34 = vpop.f32.mrb[1].mxu1 }
  0xfb   : > { %v930_v35 = vpop.f32.mrb[2].mxu1 }
  0xfc   : > { %v324_v36 = vpop.f32.mrb[3].mxu1 }
 0x101   : > { %v933_v37 = vpop.f32.mrb[4].mxu1 }
 0x102   : > { %v957_v38 = vpop.f32.mrb[4].mxu0  ;;  %v337_v39 = vpop.f32.mrb[5].mxu1 }
 0x103   : > { %v465_v40 = vadd.f32 %v957_v38, %v933_v37  ;;  %v456_v41 = vpop.f32.mrb[5].mxu0  ;;  %v934_v42 = vpop.f32.mrb[6].mxu1 }
 0x104   : > { %v457_v43 = vadd.f32 %v456_v41, %v337_v39  ;;  %v958_v44 = vpop.f32.mrb[6].mxu0  ;;  %v340_v45 = vpop.f32.mrb[7].mxu1 }
 0x105   : > { %v468_v46 = vadd.f32 %v958_v44, %v934_v42  ;;  %v459_v47 = vpop.f32.mrb[7].mxu0 }
 0x106   : > { %v460_v48 = vadd.f32 %v459_v47, %v340_v45 }
 0x119   : > { %v981_v50 = vpop.f32.mrb[8].mxu1 }
 0x11a   : > { %v977_v51 = vpop.f32.mrb[0].mxu0  ;;  %v639_v52 = vadd.f32 %v981_v50, %v465_v40  ;;  %v618_v53 = vpop.f32.mrb[9].mxu1 }
 0x11b   : > { %v999_v54 = vadd.f32 %v977_v51, %v929_v33  ;;  %v602_v55 = vpop.f32.mrb[1].mxu0  ;;  %v637_v56 = vadd.f32 %v618_v53, %v457_v43  ;;  %v982_v57 = vpop.f32.mrb[10].mxu1 }
 0x11c   : > { %v654_v58 = vadd.f32 %v832_v49, %v639_v52  ;;  %v1000_v59 = vadd.f32 %v602_v55, %v321_v34  ;;  %v978_v60 = vpop.f32.mrb[2].mxu0  ;;  %v640_v61 = vadd.f32 %v982_v57, %v468_v46  ;;  %v621_v62 = vpop.f32.mrb[11].mxu1 }
 0x11d   : > { %v650_v63 = vadd.f32 %v999_v54, %v832_v49  ;;  %v652_v0 = vadd.f32 %v832_v49, %v637_v56  ;;  %v1001_v1 = vadd.f32 %v978_v60, %v930_v35  ;;  %v605_v2 = vpop.f32.mrb[3].mxu0  ;;  %v638_v3 = vadd.f32 %v621_v62, %v460_v48 }
 0x11e   : > { %v648_v4 = vadd.f32 %v1000_v59, %v832_v49  ;;  %v655_v5 = vadd.f32 %v832_v49, %v640_v61  ;;  %v1002_v6 = vadd.f32 %v605_v2, %v324_v36  ;;  %v662_v9 = vmax.f32 %v654_v58, 0.0 }
 0x11f   : > { %v651_v7 = vadd.f32 %v1001_v1, %v832_v49  ;;  %v653_v8 = vadd.f32 %v832_v49, %v638_v3  ;;  %v658_v12 = vmax.f32 %v650_v63, 0.0  ;;  %v660_v13 = vmax.f32 %v652_v0, 0.0 }
 0x120   : > { %v663_v10 = vmax.f32 %v655_v5, 0.0  ;;  %v649_v11 = vadd.f32 %v1002_v6, %v832_v49  ;;  %v656_v16 = vmax.f32 %v648_v4, 0.0 }
 0x121   : > { %v659_v14 = vmax.f32 %v651_v7, 0.0  ;;  %v661_v15 = vmax.f32 %v653_v8, 0.0 }
 0x122   : > { %v870_v17 = vpack.c.bf16 %v663_v10, %v662_v9  ;;  %v657_v18 = vmax.f32 %v649_v11, 0.0 }
 0x123   : > { %v860_v19 = vpack.c.bf16 %v659_v14, %v658_v12  ;;  %v865_v20 = vpack.c.bf16 %v661_v15, %v660_v13 }
 0x124   : > { %874 = vst [vmem:[%s170_s21 + $0x18] sm:$0xff] %v870_v17   ;;  %v855_v21 = vpack.c.bf16 %v657_v18, %v656_v16 }
 0x125   : > { %872 = vst [vmem:[%s170_s21 + $0x8] sm:$0xff] %v860_v19   ;;  %873 = vst [vmem:[%s170_s21 + $0x10] sm:$0xff] %v865_v20  }
 0x126   : > { %856 = vst [vmem:[%s170_s21] sm:$0xff] %v855_v21  }
 0x127 PF: > { %s13_s12 = sadd.s32 1, %s1063_s12  }
 0x128   : > { %p10_p4 = scmp.ge.s32.totalorder %s13_s12, 10  }
 0x12a   :  { %12 = sbr.rel (!%p10_p4) target bundleno = 1 (0x1), region = 64 }

// kernel: _basic_block_impl.3
= control target key start
LH: loop header
LB: loop body
LE: loop exit
PB: predicated region body
PF: predicated region fallthrough
CT: control target
= control target key end

     0   :  { %s1195_s15 = smov 0   ;;  %s1309_s0 = inlined_call_operand.vmem [shape: bf16[8,96,128], index: 0, kind: input, shape index: {}]   ;;  %s1310_s1 = inlined_call_operand.vmem [shape: bf16[3,128,128], index: 1, kind: input, shape index: {}]   ;;  %s1311_s2 = inlined_call_operand.vmem [shape: f32[1,128], index: 2, kind: input, shape index: {}]   ;;  %s1312_s3 = inlined_call_operand.vmem [shape: bf16[8,64,128], index: 3, kind: input, shape index: {}]   ;;  %s1313_s4 = inlined_call_operand.vmem [shape: bf16[8,64,128], index: 4, kind: output, shape index: {}]  }
   0x1 LB: > { %s842_s16 = sadd.s32 4294967295, %s1168_s15   ;;  %p846_p0 = scmp.ge.s32.totalorder %s1168_s15, 1  ;;  %s1168_s15 = sphi %s1195_s15, %s14_s15  }
   0x2   : > { %p172_p1 = scmp.lt.s32.totalorder %s1168_s15, 9 }
   0x4   : > { %p173_p2 = pnand %p846_p0, %p172_p1 }
   0x5   : > { %v1129_v0 = vld [vmem:[%s1310_s1 + $0x40] sm:$0xff] (!%p173_p2)   ;;  %p203_p3 = scmp.lt.s32.totalorder (!%p173_p2), %s842_s16, 7  ;;  %v1131_v2 = vld [vmem:[%s1310_s1 + $0x48] sm:$0xff] (!%p173_p2)   ;;  %v1133_v4 = vld [vmem:[%s1310_s1 + $0x50] sm:$0xff] (!%p173_p2)  }
   0x6   : > { %176 = sbr.rel (%p173_p2) target bundleno = 297 (0x129), region = 36  ;;  %v1130_v1 = vld [vmem:[%s1310_s1] sm:$0xff] (!%p173_p2)   ;;  %1016 = vmatprep.subr.bf16.mxu1 (!%p173_p2), %v1129_v0  ;;  %v1132_v3 = vld [vmem:[%s1310_s1 + $0x8] sm:$0xff] (!%p173_p2)   ;;  %v1134_v5 = vld [vmem:[%s1310_s1 + $0x10] sm:$0xff] (!%p173_p2)  }
   0x7   : > { %1040 = vmatprep.subr.bf16.mxu0 (!%p173_p2), %v1130_v1  ;;  %1017 = vmatpush3.bf16.msra.mxu1 (!%p173_p2), %v1129_v0  ;;  %v1135_v6 = vld [vmem:[%s1310_s1 + $0x58] sm:$0xff] (!%p173_p2)   ;;  %v1137_v8 = vld [vmem:[%s1310_s1 + $0x60] sm:$0xff] (!%p173_p2)   ;;  %v1139_v10 = vld [vmem:[%s1310_s1 + $0x68] sm:$0xff] (!%p173_p2)  }
   0x8   : > { %1041 = vmatpush3.bf16.msra.mxu0 (!%p173_p2), %v1130_v1  ;;  %1018 = vmatprep.subr.bf16.mxu1 (!%p173_p2), %v1131_v2  ;;  %v1136_v7 = vld [vmem:[%s1310_s1 + $0x18] sm:$0xff] (!%p173_p2)   ;;  %v1138_v9 = vld [vmem:[%s1310_s1 + $0x20] sm:$0xff] (!%p173_p2)   ;;  %v1140_v12 = vld [vmem:[%s1310_s1 + $0x28] sm:$0xff] (!%p173_p2)  }
   0x9   : > { %1042 = vmatprep.subr.bf16.mxu0 (!%p173_p2), %v1132_v3  ;;  %v1141_v14 = vld [vmem:[%s1310_s1 + $0x70] sm:$0xff] (!%p173_p2)   ;;  %v1143_v16 = vld [vmem:[%s1310_s1 + $0x78] sm:$0xff] (!%p173_p2)   ;;  %v1148_v18 = vld [vmem:[%s1310_s1 + $0x80] sm:$0xff] (!%p173_p2)  }
   0xa   : > { %v1142_v15 = vld [vmem:[%s1310_s1 + $0x30] sm:$0xff] (!%p173_p2)   ;;  %v1144_v17 = vld [vmem:[%s1310_s1 + $0x38] sm:$0xff] (!%p173_p2)   ;;  %v1149_v20 = vld [vmem:[%s1310_s1 + $0x88] sm:$0xff] (!%p173_p2)  }
   0xb   : > { %1019 = vmatpush3.bf16.msra.mxu1 (!%p173_p2), %v1131_v2  ;;  %v1150_v22 = vld [vmem:[%s1310_s1 + $0x90] sm:$0xff] (!%p173_p2)   ;;  %v1151_v24 = vld [vmem:[%s1310_s1 + $0x98] sm:$0xff] (!%p173_p2)   ;;  %v1152_v27 = vld [vmem:[%s1310_s1 + $0xa0] sm:$0xff] (!%p173_p2)  }
   0xc   : > { %1043 = vmatpush3.bf16.msra.mxu0 (!%p173_p2), %v1132_v3  ;;  %1020 = vmatprep.subr.bf16.mxu1 (!%p173_p2), %v1133_v4  ;;  %v1154_v28 = vld [vmem:[%s1310_s1 + $0xa8] sm:$0xff] (!%p173_p2)   ;;  %v1156_v29 = vld [vmem:[%s1310_s1 + $0xb0] sm:$0xff] (!%p173_p2)   ;;  %v1157_v30 = vld [vmem:[%s1310_s1 + $0xb8] sm:$0xff] (!%p173_p2)  }
   0xd   : > { %s1315_s16 = smov (!%p203_p3, %s842_s16), 7  ;;  %1044 = vmatprep.subr.bf16.mxu0 %v1134_v5  ;;  %v917_v53 = vld [vmem:[%s1311_s2] ss:$0 sm:$0xff] }
   0xe   : > { %s1120_s7 = smul.u32 48, %s1315_s16 }
   0xf   : > { %1021 = vmatpush3.bf16.msra.mxu1 %v1133_v4 }
  0x10   : > { %1045 = vmatpush3.bf16.msra.mxu0 %v1134_v5  ;;  %1022 = vmatprep.subr.bf16.mxu1 %v1135_v6  ;;  %s1239_s14 = scalar_lea.vmem %s1309_s0, %s1120_s7 }
  0x11   : > { %1046 = vmatprep.subr.bf16.mxu0 %v1136_v7  ;;  %v1145_v11 = vld [vmem:[%s1239_s14 + $0x8] sm:$0xff]   ;;  %v1147_v13 = vld [vmem:[%s1239_s14] sm:$0xff]   ;;  %v1146_v19 = vld [vmem:[%s1239_s14 + $0x10] sm:$0xff]  }
  0x12   : > { %1032 = vmatprep.mubr.bf16.mxu1 %v1145_v11  ;;  %1056 = vmatprep.mubr.bf16.mxu0 %v1147_v13  ;;  %v1153_v21 = vld [vmem:[%s1239_s14 + $0x18] sm:$0xff]   ;;  %v1155_v23 = vld [vmem:[%s1239_s14 + $0x20] sm:$0xff]   ;;  %v1158_v25 = vld [vmem:[%s1239_s14 + $0x10] sm:$0xff]  }
  0x13   : > { %1023 = vmatpush3.bf16.msra.mxu1 %v1135_v6  ;;  %v1159_v26 = vld [vmem:[%s1239_s14 + $0x20] sm:$0xff]   ;;  %v1161_v31 = vld [vmem:[%s1239_s14 + $0x28] sm:$0xff]   ;;  %v1160_v32 = vld [vmem:[%s1239_s14 + $0x18] sm:$0xff]   ;;  %s928_s14 = sshll.u32 %s1315_s16, 5 }
  0x14   : > { %1047 = vmatpush3.bf16.msra.mxu0 %v1136_v7  ;;  %1024 = vmatprep.subr.bf16.mxu1 %v1137_v8  ;;  %s212_s24 = scalar_lea.vmem %s1312_s3, %s928_s14  ;;  %s217_s29 = scalar_lea.vmem %s1313_s4, %s928_s14 }
  0x15   : > { %1048 = vmatprep.subr.bf16.mxu0 %v1138_v9  ;;  %v974_v49 = vld [vmem:[%s212_s24 + $0x8] sm:$0xff]   ;;  %v976_v50 = vld [vmem:[%s212_s24 + $0x18] sm:$0xff]   ;;  %v939_v51 = vld [vmem:[%s212_s24] sm:$0xff]  }
  0x16   : > { %v975_v52 = vld [vmem:[%s212_s24 + $0x10] sm:$0xff]   ;;  %v944_v54 = vunpack.c.l.bf16 %v974_v49  ;;  %v952_v56 = vunpack.c.l.bf16 %v976_v50  ;;  %v940_v59 = vunpack.c.l.bf16 %v939_v51  ;;  %v945_v62 = vunpack.c.h.bf16 %v974_v49 }
  0x17   : > { %1025 = vmatpush3.bf16.msra.mxu1 %v1137_v8  ;;  %v948_v61 = vunpack.c.l.bf16 %v975_v52  ;;  %v953_v3 = vunpack.c.h.bf16 %v976_v50  ;;  %v941_v4 = vunpack.c.h.bf16 %v939_v51 }
  0x18   : > { %1049 = vmatpush3.bf16.msra.mxu0 %v1138_v9  ;;  %1026 = vmatprep.subr.bf16.mxu1 %v1139_v10 }
  0x19   : > { %1050 = vmatprep.subr.bf16.mxu0 %v1140_v12 }
  0x1b   : > { %1027 = vmatpush3.bf16.msra.mxu1 %v1139_v10  ;;  %v949_v10 = vunpack.c.h.bf16 %v975_v52 }
  0x1c   : > { %1051 = vmatpush3.bf16.msra.mxu0 %v1140_v12  ;;  %1028 = vmatprep.subr.bf16.mxu1 %v1141_v14 }
  0x1d   : > { %1052 = vmatprep.subr.bf16.mxu0 %v1142_v15 }
  0x1f   : > { %1029 = vmatpush3.bf16.msra.mxu1 %v1141_v14 }
  0x20   : > { %1053 = vmatpush3.bf16.msra.mxu0 %v1142_v15  ;;  %1030 = vmatprep.subr.bf16.mxu1 %v1143_v16 }
  0x21   : > { %1054 = vmatprep.subr.bf16.mxu0 %v1144_v17 }
  0x23   : > { %1031 = vmatpush3.bf16.msra.mxu1 %v1143_v16 }
  0x24   : > { %1055 = vmatpush3.bf16.msra.mxu0 %v1144_v17  ;;  %1088 = vmatprep.subr.bf16.mxu1 %v1148_v18 }
  0x25   : > { %1064 = vmatprep.subr.bf16.mxu0 %v1148_v18 }
  0x26   : > { %1033 = vmatmul.mubr.bf16.vlgmr.msra.gmra.mrb[0].mxu1 %v1146_v19 }
  0x27   : > { %1057 = vmatmul.mubr.bf16.vlgmr.msra.gmra.mrb[0].mxu0 %v1145_v11  ;;  %1096 = vmatpush3.bf16.msra.mxu1 %v1148_v18 }
  0x28   : > { %1065 = vmatpush3.bf16.msra.mxu0 %v1148_v18  ;;  %1089 = vmatprep.subr.bf16.mxu1 %v1149_v20 }
  0x29   : > { %1066 = vmatprep.subr.bf16.mxu0 %v1149_v20  ;;  %1036 = vmatprep.mubr.bf16.mxu1 %v1153_v21 }
  0x2a   : > { %1060 = vmatprep.mubr.bf16.mxu0 %v1146_v19 }
  0x2b   : > { %1097 = vmatpush3.bf16.msra.mxu1 %v1149_v20 }
  0x2c   : > { %1067 = vmatpush3.bf16.msra.mxu0 %v1149_v20  ;;  %1090 = vmatprep.subr.bf16.mxu1 %v1150_v22 }
  0x2d   : > { %1068 = vmatprep.subr.bf16.mxu0 %v1150_v22 }
  0x2e   : > { %1037 = vmatmul.mubr.bf16.gmra.mrb[4].mxu1 %v1155_v23 }
  0x2f   : > { %1098 = vmatpush3.bf16.msra.mxu1 %v1150_v22  ;;  %1061 = vmatmul.mubr.bf16.gmra.mrb[4].mxu0 %v1153_v21 }
  0x30   : > { %1069 = vmatpush3.bf16.msra.mxu0 %v1150_v22  ;;  %1091 = vmatprep.subr.bf16.mxu1 %v1151_v24 }
  0x31   : > { %1070 = vmatprep.subr.bf16.mxu0 %v1151_v24  ;;  %1080 = vmatprep.mubr.bf16.mxu0 %v1158_v25 }
  0x32   : > { %1084 = vmatprep.mubr.bf16.mxu1 %v1159_v26 }
  0x33   : > { %1099 = vmatpush3.bf16.msra.mxu1 %v1151_v24 }
  0x34   : > { %1071 = vmatpush3.bf16.msra.mxu0 %v1151_v24  ;;  %1092 = vmatprep.subr.bf16.mxu1 %v1152_v27 }
  0x35   : > { %1072 = vmatprep.subr.bf16.mxu0 %v1152_v27 }
  0x37   : > { %1100 = vmatpush3.bf16.msra.mxu1 %v1152_v27 }
  0x38   : > { %1073 = vmatpush3.bf16.msra.mxu0 %v1152_v27  ;;  %1093 = vmatprep.subr.bf16.mxu1 %v1154_v28 }
  0x39   : > { %1074 = vmatprep.subr.bf16.mxu0 %v1154_v28 }
  0x3b   : > { %1101 = vmatpush3.bf16.msra.mxu1 %v1154_v28 }
  0x3c   : > { %1075 = vmatpush3.bf16.msra.mxu0 %v1154_v28  ;;  %1094 = vmatprep.subr.bf16.mxu1 %v1156_v29 }
  0x3d   : > { %1076 = vmatprep.subr.bf16.mxu0 %v1156_v29 }
  0x3f   : > { %1102 = vmatpush3.bf16.msra.mxu1 %v1156_v29 }
  0x40   : > { %1077 = vmatpush3.bf16.msra.mxu0 %v1156_v29  ;;  %1095 = vmatprep.subr.bf16.mxu1 %v1157_v30 }
  0x41   : > { %1078 = vmatprep.subr.bf16.mxu0 %v1157_v30 }
  0x43   : > { %1103 = vmatpush3.bf16.msra.mxu1 %v1157_v30 }
  0x44   : > { %1079 = vmatpush3.bf16.msra.mxu0 %v1157_v30 }
  0x46   : > { %1085 = vmatmul.mubr.bf16.vlgmr.msra.gmra.mrb[8].mxu1 %v1161_v31 }
  0x47   : > { %1081 = vmatmul.mubr.bf16.vlgmr.msra.gmra.mrb[0].mxu0 %v1160_v32 }
  0xf9   : > { %v1034_v33 = vpop.f32.mrb[0].mxu1 }
  0xfa   : > { %v368_v34 = vpop.f32.mrb[1].mxu1 }
  0xfb   : > { %v1035_v35 = vpop.f32.mrb[2].mxu1 }
  0xfc   : > { %v371_v36 = vpop.f32.mrb[3].mxu1 }
 0x101   : > { %v1038_v37 = vpop.f32.mrb[4].mxu1 }
 0x102   : > { %v1062_v38 = vpop.f32.mrb[4].mxu0  ;;  %v384_v39 = vpop.f32.mrb[5].mxu1 }
 0x103   : > { %v512_v40 = vadd.f32 %v1062_v38, %v1038_v37  ;;  %v503_v41 = vpop.f32.mrb[5].mxu0  ;;  %v1039_v42 = vpop.f32.mrb[6].mxu1 }
 0x104   : > { %v504_v43 = vadd.f32 %v503_v41, %v384_v39  ;;  %v1063_v44 = vpop.f32.mrb[6].mxu0  ;;  %v387_v45 = vpop.f32.mrb[7].mxu1 }
 0x105   : > { %v515_v46 = vadd.f32 %v1063_v44, %v1039_v42  ;;  %v506_v47 = vpop.f32.mrb[7].mxu0 }
 0x106   : > { %v507_v48 = vadd.f32 %v506_v47, %v387_v45 }
 0x119   : > { %v1086_v55 = vpop.f32.mrb[8].mxu1 }
 0x11a   : > { %v1082_v57 = vpop.f32.mrb[0].mxu0  ;;  %v686_v58 = vadd.f32 %v1086_v55, %v512_v40  ;;  %v665_v60 = vpop.f32.mrb[9].mxu1 }
 0x11b   : > { %v1104_v63 = vadd.f32 %v1082_v57, %v1034_v33  ;;  %v649_v0 = vpop.f32.mrb[1].mxu0  ;;  %v684_v1 = vadd.f32 %v665_v60, %v504_v43  ;;  %v1087_v2 = vpop.f32.mrb[10].mxu1 }
 0x11c   : > { %v701_v5 = vadd.f32 %v917_v53, %v686_v58  ;;  %v1105_v6 = vadd.f32 %v649_v0, %v368_v34  ;;  %v1083_v7 = vpop.f32.mrb[2].mxu0  ;;  %v687_v8 = vadd.f32 %v1087_v2, %v515_v46  ;;  %v668_v9 = vpop.f32.mrb[11].mxu1 }
 0x11d   : > { %v697_v11 = vadd.f32 %v1104_v63, %v917_v53  ;;  %v699_v12 = vadd.f32 %v917_v53, %v684_v1  ;;  %v1106_v13 = vadd.f32 %v1083_v7, %v1035_v35  ;;  %v652_v14 = vpop.f32.mrb[3].mxu0  ;;  %v685_v15 = vadd.f32 %v668_v9, %v507_v48 }
 0x11e   : > { %v725_v16 = vadd.f32 %v952_v56, %v701_v5  ;;  %v695_v17 = vadd.f32 %v1105_v6, %v917_v53  ;;  %v702_v18 = vadd.f32 %v917_v53, %v687_v8  ;;  %v1107_v19 = vadd.f32 %v652_v14, %v371_v36 }
 0x11f   : > { %v721_v20 = vadd.f32 %v944_v54, %v697_v11  ;;  %v723_v21 = vadd.f32 %v948_v61, %v699_v12  ;;  %v698_v22 = vadd.f32 %v1106_v13, %v917_v53  ;;  %v700_v23 = vadd.f32 %v917_v53, %v685_v15 }
 0x120   : > { %v719_v24 = vadd.f32 %v940_v59, %v695_v17  ;;  %v726_v25 = vadd.f32 %v953_v3, %v702_v18  ;;  %v696_v26 = vadd.f32 %v1107_v19, %v917_v53  ;;  %v733_v29 = vmax.f32 %v725_v16, 0.0 }
 0x121   : > { %v722_v27 = vadd.f32 %v945_v62, %v698_v22  ;;  %v724_v28 = vadd.f32 %v949_v10, %v700_v23  ;;  %v729_v32 = vmax.f32 %v721_v20, 0.0  ;;  %v731_v33 = vmax.f32 %v723_v21, 0.0 }
 0x122   : > { %v734_v30 = vmax.f32 %v726_v25, 0.0  ;;  %v720_v31 = vadd.f32 %v941_v4, %v696_v26  ;;  %v727_v36 = vmax.f32 %v719_v24, 0.0 }
 0x123   : > { %v730_v34 = vmax.f32 %v722_v27, 0.0  ;;  %v732_v35 = vmax.f32 %v724_v28, 0.0 }
 0x124   : > { %v972_v37 = vpack.c.bf16 %v734_v30, %v733_v29  ;;  %v728_v38 = vmax.f32 %v720_v31, 0.0 }
 0x125   : > { %v962_v39 = vpack.c.bf16 %v730_v34, %v729_v32  ;;  %v967_v40 = vpack.c.bf16 %v732_v35, %v731_v33 }
 0x126   : > { %979 = vst [vmem:[%s217_s29 + $0x18] sm:$0xff] %v972_v37   ;;  %v957_v41 = vpack.c.bf16 %v728_v38, %v727_v36 }
 0x127   : > { %977 = vst [vmem:[%s217_s29 + $0x8] sm:$0xff] %v962_v39   ;;  %978 = vst [vmem:[%s217_s29 + $0x10] sm:$0xff] %v967_v40  }
 0x128   : > { %958 = vst [vmem:[%s217_s29] sm:$0xff] %v957_v41  }
 0x129 PF: > { %s14_s15 = sadd.s32 1, %s1168_s15  }
 0x12a   : > { %p11_p4 = scmp.ge.s32.totalorder %s14_s15, 10  }
 0x12c   :  { %13 = sbr.rel (!%p11_p4) target bundleno = 1 (0x1), region = 71 }

</bundles_post_ra>
